<compile_context>
chip_gen: v6e
topology: v6e:2x2x1
jax: 0.10.0
libtpu: 0.0.40
codegen_flags: <defaults>
</compile_context>

<pallas_src>
import functools

import jax
import jax.numpy as jnp
from jax.experimental import pallas as pl
from jax.experimental.pallas import tpu as pltpu


def _choose_batch_tile(batch: int, seq: int, target_rows: int = 256) -> int:
    """Smallest divisor Bt of `batch` with Bt*seq >= target_rows.

    This fills the MXU's M dimension while keeping the grid as long as
    possible (so v7x's two TensorCores both get work). Falls back to the whole
    batch if no tile reaches the target (tiny problems).
    """
    for bt in range(1, batch + 1):
        if batch % bt == 0 and bt * seq >= target_rows:
            return bt
    return batch


def _mhsa_kernel(x_ref, wq_ref, wk_ref, wv_ref, wout_ref, bout_ref, o_ref,
                 *, heads: int, dim_head: int, scale: float):
    """One (Bt, N, D) batch-tile per grid step.

    x_ref    : (Bt, N, D)     input tokens (compute dtype: f32 or bf16)
    wq_ref   : (H, D, Dh)     per-head query weights
    wk_ref   : (H, D, Dh)     per-head key weights
    wv_ref   : (H, D, Dh)     per-head value weights
    wout_ref : (H, Dh, D)     per-head slice of the output projection
    bout_ref : (1, D)         output-projection bias (f32)
    o_ref    : (Bt, N, D)     output tokens (same dtype as the caller's x)
    """
    Bt, N, D = x_ref.shape
    M = Bt * N
    cdt = x_ref.dtype  # MXU operand dtype (f32 or bf16); accumulation is f32.

    # Tall-M operand for every projection matmul.
    x = x_ref[...].reshape(M, D)

    acc = jnp.zeros((M, D), jnp.float32)
    for h in range(heads):  # heads is a small static constant -> unrolled
        # Per-head projections (M, D) @ (D, Dh). Weights were pre-split per
        # head in the wrapper, so no lane-slicing of activations is needed.
        q = jnp.dot(x, wq_ref[h], preferred_element_type=jnp.float32).astype(cdt)
        k = jnp.dot(x, wk_ref[h], preferred_element_type=jnp.float32).astype(cdt)
        v = jnp.dot(x, wv_ref[h], preferred_element_type=jnp.float32).astype(cdt)

        qb = q.reshape(Bt, N, dim_head)
        kb = k.reshape(Bt, N, dim_head)
        vb = v.reshape(Bt, N, dim_head)

        # Scores via a batched contraction over the last dims — no explicit
        # .T, so no per-head XLU transpose.  (Bt, N, N), f32.
        s = jnp.einsum('bik,bjk->bij', qb, kb,
                       preferred_element_type=jnp.float32) * scale

        # Numerically stable softmax, kept in f32.
        m = jnp.max(s, axis=-1, keepdims=True)
        e = jnp.exp(s - m)
        denom = jnp.sum(e, axis=-1, keepdims=True)

        # Un-normalized weighted sum of values; normalize once afterwards.
        o_un = jnp.einsum('bij,bjk->bik', e.astype(cdt), vb,
                          preferred_element_type=jnp.float32)  # (Bt, N, Dh)

        # EUP approximate reciprocal (otherwise-idle slot) + one Newton step to
        # recover f32-level accuracy without a VALU divide sequence.
        r = pl.reciprocal(denom, approx=True)
        r = r * (2.0 - denom * r)
        ob = (o_un * r).astype(cdt).reshape(M, dim_head)

        # Fused output projection: accumulate this head's contribution into the
        # (M, D) result — removes the (M, inner) concat and its lane shuffles.
        acc = acc + jnp.dot(ob, wout_ref[h], preferred_element_type=jnp.float32)

    out = acc + bout_ref[...].astype(jnp.float32)  # (1, D) broadcasts over (M, D)
    o_ref[...] = out.reshape(Bt, N, D).astype(o_ref.dtype)


def multi_head_self_attention(x, w_qkv, w_out, b_out, *, heads, dim_head,
                              compute_dtype=jnp.float32):
    """x: (B, N, D). w_qkv: (D, 3*heads*dim_head) (i.e. Linear weight pre-
    transposed to (in, out)). w_out: (heads*dim_head, D). b_out: (D,).

    compute_dtype: dtype of the MXU operands (jnp.bfloat16 on v6e/v7x for ~2x
    matmul throughput); accumulation/softmax always run in f32 and the output
    is returned in x.dtype.
    """
    B, N, D = x.shape
    scale = dim_head ** -0.5

    # Pre-split / pre-arrange the weights OUTSIDE the kernel so the kernel
    # never lane-slices, transposes or concatenates along the head axis.
    w3 = w_qkv.reshape(D, 3, heads, dim_head)
    wq = jnp.transpose(w3[:, 0], (1, 0, 2)).astype(compute_dtype)  # (H, D, Dh)
    wk = jnp.transpose(w3[:, 1], (1, 0, 2)).astype(compute_dtype)  # (H, D, Dh)
    wv = jnp.transpose(w3[:, 2], (1, 0, 2)).astype(compute_dtype)  # (H, D, Dh)
    wo = w_out.reshape(heads, dim_head, D).astype(compute_dtype)   # (H, Dh, D)
    b2 = b_out.reshape(1, D).astype(jnp.float32)
    xc = x.astype(compute_dtype)

    bt = _choose_batch_tile(B, N)
    grid = (B // bt,)

    kernel = functools.partial(
        _mhsa_kernel, heads=heads, dim_head=dim_head, scale=scale)

    return pl.pallas_call(
        kernel,
        out_shape=jax.ShapeDtypeStruct((B, N, D), x.dtype),
        grid_spec=pltpu.PrefetchScalarGridSpec(
            num_scalar_prefetch=0,
            grid=grid,
            in_specs=[
                pl.BlockSpec((bt, N, D), lambda b: (b, 0, 0)),
                pl.BlockSpec((heads, D, dim_head), lambda b: (0, 0, 0)),
                pl.BlockSpec((heads, D, dim_head), lambda b: (0, 0, 0)),
                pl.BlockSpec((heads, D, dim_head), lambda b: (0, 0, 0)),
                pl.BlockSpec((heads, dim_head, D), lambda b: (0, 0, 0)),
                pl.BlockSpec((1, D), lambda b: (0, 0)),
            ],
            out_specs=pl.BlockSpec((bt, N, D), lambda b: (b, 0, 0)),
        ),
        compiler_params=pltpu.CompilerParams(
            dimension_semantics=("parallel",),
            vmem_limit_bytes=48 * 1024 * 1024,
        ),
    )(xc, wq, wk, wv, wo, b2)


def _reference(x, w_qkv, w_out, b_out, *, heads, dim_head):
    """Pure-JAX reference mirroring the PyTorch forward (eval mode)."""
    B, N, D = x.shape
    inner = heads * dim_head
    scale = dim_head ** -0.5
    qkv = jnp.einsum('bnd,de->bne', x, w_qkv)
    q, k, v = jnp.split(qkv, 3, axis=-1)

    def split_heads(t):
        return t.reshape(B, N, heads, dim_head).transpose(0, 2, 1, 3)

    q, k, v = map(split_heads, (q, k, v))
    dots = jnp.einsum('bhid,bhjd->bhij', q, k) * scale
    attn = jax.nn.softmax(dots, axis=-1)
    out = jnp.einsum('bhij,bhjd->bhid', attn, v)
    out = out.transpose(0, 2, 1, 3).reshape(B, N, inner)
    return jnp.einsum('bni,id->bnd', out, w_out) + b_out[None, None, :]


if __name__ == "__main__":
    # Small, deterministic problem consistent with the module's forward:
    # batch=2, seq=8, dim=32, heads=4, dim_head=16 -> inner_dim=64, project_out.
    B, N, DIM = 2, 8, 32
    HEADS, DIM_HEAD = 4, 16
    INNER = HEADS * DIM_HEAD

    key = jax.random.PRNGKey(0)
    kx, kqkv, kwout, kbout = jax.random.split(key, 4)

    x = jax.random.normal(kx, (B, N, DIM), dtype=jnp.float32)
    # nn.Linear(dim, inner*3, bias=False): weight (inner*3, dim); stored transposed.
    w_qkv = jax.random.normal(kqkv, (DIM, 3 * INNER), dtype=jnp.float32) * (DIM ** -0.5)
    # nn.Linear(inner, dim): weight (dim, inner) + bias (dim,); stored transposed.
    w_out = jax.random.normal(kwout, (INNER, DIM), dtype=jnp.float32) * (INNER ** -0.5)
    b_out = jax.random.normal(kbout, (DIM,), dtype=jnp.float32) * 0.01

    ref = _reference(x, w_qkv, w_out, b_out, heads=HEADS, dim_head=DIM_HEAD)

    # f32 operand path (reference-accurate).
    out = multi_head_self_attention(
        x, w_qkv, w_out, b_out, heads=HEADS, dim_head=DIM_HEAD)
    out = jax.block_until_ready(out)
    assert out.shape == (B, N, DIM)
    assert jnp.allclose(out, ref, atol=1e-3, rtol=1e-3), "f32 mismatch vs reference"

    # bf16 MXU-operand fast path (v6e/v7x); f32 accumulation + f32 softmax.
    out_bf16 = multi_head_self_attention(
        x, w_qkv, w_out, b_out, heads=HEADS, dim_head=DIM_HEAD,
        compute_dtype=jnp.bfloat16)
    out_bf16 = jax.block_until_ready(out_bf16)
    assert out_bf16.shape == (B, N, DIM)
    assert jnp.allclose(out_bf16, ref, atol=1e-1, rtol=1e-1), "bf16 mismatch vs reference"

    print("KERNEL_OK")
</pallas_src>

<mosaic_0001>
module attributes {stable_mosaic.version = 11 : i64} {
  func.func @_mhsa_kernel(%arg0: i32, %arg1: memref<2x8x32xf32, #tpu.memory_space<vmem>>, %arg2: memref<4x32x16xf32, #tpu.memory_space<vmem>>, %arg3: memref<4x32x16xf32, #tpu.memory_space<vmem>>, %arg4: memref<4x32x16xf32, #tpu.memory_space<vmem>>, %arg5: memref<4x16x32xf32, #tpu.memory_space<vmem>>, %arg6: memref<1x32xf32, #tpu.memory_space<vmem>>, %arg7: memref<2x8x32xf32, #tpu.memory_space<vmem>>) attributes {dimension_semantics = [#tpu.dimension_semantics<parallel>], iteration_bounds = array<i64: 1>, scalar_prefetch = 0 : i64, scratch_operands = 0 : i64, tpu.core_type = #tpu.core_type<tc>, window_params = [{transform_indices = @transform_0, window_bounds = array<i64: 2, 8, 32>}, {pipeline_mode = #tpu.pipeline_mode<synchronous>, transform_indices = @transform_1, window_bounds = array<i64: 4, 32, 16>}, {pipeline_mode = #tpu.pipeline_mode<synchronous>, transform_indices = @transform_2, window_bounds = array<i64: 4, 32, 16>}, {pipeline_mode = #tpu.pipeline_mode<synchronous>, transform_indices = @transform_3, window_bounds = array<i64: 4, 32, 16>}, {pipeline_mode = #tpu.pipeline_mode<synchronous>, transform_indices = @transform_4, window_bounds = array<i64: 4, 16, 32>}, {pipeline_mode = #tpu.pipeline_mode<synchronous>, transform_indices = @transform_5, window_bounds = array<i64: 1, 32>}, {transform_indices = @transform_6, window_bounds = array<i64: 2, 8, 32>}]} {
    %c0 = arith.constant 0 : index
    %c0_0 = arith.constant 0 : index
    %c0_1 = arith.constant 0 : index
    %0 = vector.load %arg1[%c0, %c0_0, %c0_1] : memref<2x8x32xf32, #tpu.memory_space<vmem>>, vector<2x8x32xf32>
    %1 = vector.shape_cast %0 : vector<2x8x32xf32> to vector<16x32xf32>
    %cst = arith.constant 0.000000e+00 : f32
    %2 = vector.broadcast %cst : f32 to vector<16x32xf32>
    %c0_2 = arith.constant 0 : index
    %c0_3 = arith.constant 0 : index
    %c0_4 = arith.constant 0 : index
    %3 = vector.load %arg2[%c0_2, %c0_3, %c0_4] : memref<4x32x16xf32, #tpu.memory_space<vmem>>, vector<1x32x16xf32>
    %4 = vector.shape_cast %3 : vector<1x32x16xf32> to vector<32x16xf32>
    %cst_5 = arith.constant dense<0.000000e+00> : vector<16x16xf32>
    %5 = tpu.matmul %1, %4, %cst_5 {dimension_numbers = #tpu.dot_dimension_numbers<[1], [0], [0], [1], [0, 0, 1, 1], [], []>} : vector<16x32xf32>, vector<32x16xf32>, vector<16x16xf32> -> vector<16x16xf32>
    %c0_6 = arith.constant 0 : index
    %c0_7 = arith.constant 0 : index
    %c0_8 = arith.constant 0 : index
    %6 = vector.load %arg3[%c0_6, %c0_7, %c0_8] : memref<4x32x16xf32, #tpu.memory_space<vmem>>, vector<1x32x16xf32>
    %7 = vector.shape_cast %6 : vector<1x32x16xf32> to vector<32x16xf32>
    %cst_9 = arith.constant dense<0.000000e+00> : vector<16x16xf32>
    %8 = tpu.matmul %1, %7, %cst_9 {dimension_numbers = #tpu.dot_dimension_numbers<[1], [0], [0], [1], [0, 0, 1, 1], [], []>} : vector<16x32xf32>, vector<32x16xf32>, vector<16x16xf32> -> vector<16x16xf32>
    %c0_10 = arith.constant 0 : index
    %c0_11 = arith.constant 0 : index
    %c0_12 = arith.constant 0 : index
    %9 = vector.load %arg4[%c0_10, %c0_11, %c0_12] : memref<4x32x16xf32, #tpu.memory_space<vmem>>, vector<1x32x16xf32>
    %10 = vector.shape_cast %9 : vector<1x32x16xf32> to vector<32x16xf32>
    %cst_13 = arith.constant dense<0.000000e+00> : vector<16x16xf32>
    %11 = tpu.matmul %1, %10, %cst_13 {dimension_numbers = #tpu.dot_dimension_numbers<[1], [0], [0], [1], [0, 0, 1, 1], [], []>} : vector<16x32xf32>, vector<32x16xf32>, vector<16x16xf32> -> vector<16x16xf32>
    %12 = vector.shape_cast %5 : vector<16x16xf32> to vector<2x8x16xf32>
    %13 = vector.shape_cast %8 : vector<16x16xf32> to vector<2x8x16xf32>
    %14 = vector.shape_cast %11 : vector<16x16xf32> to vector<2x8x16xf32>
    "tpu.trace_start"() <{level = 10 : i32, message = "bik,bjk->bij"}> : () -> ()
    %cst_14 = arith.constant dense<0.000000e+00> : vector<2x8x8xf32>
    %15 = tpu.matmul %12, %13, %cst_14 {dimension_numbers = #tpu.dot_dimension_numbers<[2], [2], [1], [1], [0, 0, 0, 1, 1, 1], [0], [0]>} : vector<2x8x16xf32>, vector<2x8x16xf32>, vector<2x8x8xf32> -> vector<2x8x8xf32>
    "tpu.trace_stop"() : () -> ()
    %cst_15 = arith.constant 2.500000e-01 : f32
    %16 = vector.broadcast %cst_15 : f32 to vector<2x8x8xf32>
    %17 = arith.mulf %15, %16 : vector<2x8x8xf32>
    %cst_16 = arith.constant dense<0xFF800000> : vector<2x8xf32>
    %18 = vector.multi_reduction <maximumf>, %17, %cst_16 [2] : vector<2x8x8xf32> to vector<2x8xf32>
    %19 = vector.shape_cast %18 : vector<2x8xf32> to vector<2x8x1xf32>
    %20 = vector.broadcast %19 : vector<2x8x1xf32> to vector<2x8x8xf32>
    %21 = arith.subf %17, %20 : vector<2x8x8xf32>
    %22 = math.exp %21 : vector<2x8x8xf32>
    %cst_17 = arith.constant dense<0.000000e+00> : vector<2x8xf32>
    %23 = vector.multi_reduction <add>, %22, %cst_17 [2] : vector<2x8x8xf32> to vector<2x8xf32>
    %24 = vector.shape_cast %23 : vector<2x8xf32> to vector<2x8x1xf32>
    "tpu.trace_start"() <{level = 10 : i32, message = "bij,bjk->bik"}> : () -> ()
    %cst_18 = arith.constant dense<0.000000e+00> : vector<2x8x16xf32>
    %25 = tpu.matmul %22, %14, %cst_18 {dimension_numbers = #tpu.dot_dimension_numbers<[2], [1], [1], [2], [0, 0, 0, 1, 1, 2], [0], [0]>} : vector<2x8x8xf32>, vector<2x8x16xf32>, vector<2x8x16xf32> -> vector<2x8x16xf32>
    "tpu.trace_stop"() : () -> ()
    %26 = tpu.reciprocal %24 {approx = true} : vector<2x8x1xf32> -> vector<2x8x1xf32>
    %27 = arith.mulf %24, %26 : vector<2x8x1xf32>
    %cst_19 = arith.constant 2.000000e+00 : f32
    %28 = vector.broadcast %cst_19 : f32 to vector<2x8x1xf32>
    %29 = arith.subf %28, %27 : vector<2x8x1xf32>
    %30 = arith.mulf %26, %29 : vector<2x8x1xf32>
    %31 = vector.broadcast %30 : vector<2x8x1xf32> to vector<2x8x16xf32>
    %32 = arith.mulf %25, %31 : vector<2x8x16xf32>
    %33 = vector.shape_cast %32 : vector<2x8x16xf32> to vector<16x16xf32>
    %c0_20 = arith.constant 0 : index
    %c0_21 = arith.constant 0 : index
    %c0_22 = arith.constant 0 : index
    %34 = vector.load %arg5[%c0_20, %c0_21, %c0_22] : memref<4x16x32xf32, #tpu.memory_space<vmem>>, vector<1x16x32xf32>
    %35 = vector.shape_cast %34 : vector<1x16x32xf32> to vector<16x32xf32>
    %cst_23 = arith.constant dense<0.000000e+00> : vector<16x32xf32>
    %36 = tpu.matmul %33, %35, %cst_23 {dimension_numbers = #tpu.dot_dimension_numbers<[1], [0], [0], [1], [0, 0, 1, 1], [], []>} : vector<16x16xf32>, vector<16x32xf32>, vector<16x32xf32> -> vector<16x32xf32>
    %37 = arith.addf %2, %36 : vector<16x32xf32>
    %c1 = arith.constant 1 : index
    %c0_24 = arith.constant 0 : index
    %c0_25 = arith.constant 0 : index
    %38 = vector.load %arg2[%c1, %c0_24, %c0_25] : memref<4x32x16xf32, #tpu.memory_space<vmem>>, vector<1x32x16xf32>
    %39 = vector.shape_cast %38 : vector<1x32x16xf32> to vector<32x16xf32>
    %cst_26 = arith.constant dense<0.000000e+00> : vector<16x16xf32>
    %40 = tpu.matmul %1, %39, %cst_26 {dimension_numbers = #tpu.dot_dimension_numbers<[1], [0], [0], [1], [0, 0, 1, 1], [], []>} : vector<16x32xf32>, vector<32x16xf32>, vector<16x16xf32> -> vector<16x16xf32>
    %c1_27 = arith.constant 1 : index
    %c0_28 = arith.constant 0 : index
    %c0_29 = arith.constant 0 : index
    %41 = vector.load %arg3[%c1_27, %c0_28, %c0_29] : memref<4x32x16xf32, #tpu.memory_space<vmem>>, vector<1x32x16xf32>
    %42 = vector.shape_cast %41 : vector<1x32x16xf32> to vector<32x16xf32>
    %cst_30 = arith.constant dense<0.000000e+00> : vector<16x16xf32>
    %43 = tpu.matmul %1, %42, %cst_30 {dimension_numbers = #tpu.dot_dimension_numbers<[1], [0], [0], [1], [0, 0, 1, 1], [], []>} : vector<16x32xf32>, vector<32x16xf32>, vector<16x16xf32> -> vector<16x16xf32>
    %c1_31 = arith.constant 1 : index
    %c0_32 = arith.constant 0 : index
    %c0_33 = arith.constant 0 : index
    %44 = vector.load %arg4[%c1_31, %c0_32, %c0_33] : memref<4x32x16xf32, #tpu.memory_space<vmem>>, vector<1x32x16xf32>
    %45 = vector.shape_cast %44 : vector<1x32x16xf32> to vector<32x16xf32>
    %cst_34 = arith.constant dense<0.000000e+00> : vector<16x16xf32>
    %46 = tpu.matmul %1, %45, %cst_34 {dimension_numbers = #tpu.dot_dimension_numbers<[1], [0], [0], [1], [0, 0, 1, 1], [], []>} : vector<16x32xf32>, vector<32x16xf32>, vector<16x16xf32> -> vector<16x16xf32>
    %47 = vector.shape_cast %40 : vector<16x16xf32> to vector<2x8x16xf32>
    %48 = vector.shape_cast %43 : vector<16x16xf32> to vector<2x8x16xf32>
    %49 = vector.shape_cast %46 : vector<16x16xf32> to vector<2x8x16xf32>
    "tpu.trace_start"() <{level = 10 : i32, message = "bik,bjk->bij"}> : () -> ()
    %cst_35 = arith.constant dense<0.000000e+00> : vector<2x8x8xf32>
    %50 = tpu.matmul %47, %48, %cst_35 {dimension_numbers = #tpu.dot_dimension_numbers<[2], [2], [1], [1], [0, 0, 0, 1, 1, 1], [0], [0]>} : vector<2x8x16xf32>, vector<2x8x16xf32>, vector<2x8x8xf32> -> vector<2x8x8xf32>
    "tpu.trace_stop"() : () -> ()
    %cst_36 = arith.constant 2.500000e-01 : f32
    %51 = vector.broadcast %cst_36 : f32 to vector<2x8x8xf32>
    %52 = arith.mulf %50, %51 : vector<2x8x8xf32>
    %cst_37 = arith.constant dense<0xFF800000> : vector<2x8xf32>
    %53 = vector.multi_reduction <maximumf>, %52, %cst_37 [2] : vector<2x8x8xf32> to vector<2x8xf32>
    %54 = vector.shape_cast %53 : vector<2x8xf32> to vector<2x8x1xf32>
    %55 = vector.broadcast %54 : vector<2x8x1xf32> to vector<2x8x8xf32>
    %56 = arith.subf %52, %55 : vector<2x8x8xf32>
    %57 = math.exp %56 : vector<2x8x8xf32>
    %cst_38 = arith.constant dense<0.000000e+00> : vector<2x8xf32>
    %58 = vector.multi_reduction <add>, %57, %cst_38 [2] : vector<2x8x8xf32> to vector<2x8xf32>
    %59 = vector.shape_cast %58 : vector<2x8xf32> to vector<2x8x1xf32>
    "tpu.trace_start"() <{level = 10 : i32, message = "bij,bjk->bik"}> : () -> ()
    %cst_39 = arith.constant dense<0.000000e+00> : vector<2x8x16xf32>
    %60 = tpu.matmul %57, %49, %cst_39 {dimension_numbers = #tpu.dot_dimension_numbers<[2], [1], [1], [2], [0, 0, 0, 1, 1, 2], [0], [0]>} : vector<2x8x8xf32>, vector<2x8x16xf32>, vector<2x8x16xf32> -> vector<2x8x16xf32>
    "tpu.trace_stop"() : () -> ()
    %61 = tpu.reciprocal %59 {approx = true} : vector<2x8x1xf32> -> vector<2x8x1xf32>
    %62 = arith.mulf %59, %61 : vector<2x8x1xf32>
    %cst_40 = arith.constant 2.000000e+00 : f32
    %63 = vector.broadcast %cst_40 : f32 to vector<2x8x1xf32>
    %64 = arith.subf %63, %62 : vector<2x8x1xf32>
    %65 = arith.mulf %61, %64 : vector<2x8x1xf32>
    %66 = vector.broadcast %65 : vector<2x8x1xf32> to vector<2x8x16xf32>
    %67 = arith.mulf %60, %66 : vector<2x8x16xf32>
    %68 = vector.shape_cast %67 : vector<2x8x16xf32> to vector<16x16xf32>
    %c1_41 = arith.constant 1 : index
    %c0_42 = arith.constant 0 : index
    %c0_43 = arith.constant 0 : index
    %69 = vector.load %arg5[%c1_41, %c0_42, %c0_43] : memref<4x16x32xf32, #tpu.memory_space<vmem>>, vector<1x16x32xf32>
    %70 = vector.shape_cast %69 : vector<1x16x32xf32> to vector<16x32xf32>
    %cst_44 = arith.constant dense<0.000000e+00> : vector<16x32xf32>
    %71 = tpu.matmul %68, %70, %cst_44 {dimension_numbers = #tpu.dot_dimension_numbers<[1], [0], [0], [1], [0, 0, 1, 1], [], []>} : vector<16x16xf32>, vector<16x32xf32>, vector<16x32xf32> -> vector<16x32xf32>
    %72 = arith.addf %37, %71 : vector<16x32xf32>
    %c2 = arith.constant 2 : index
    %c0_45 = arith.constant 0 : index
    %c0_46 = arith.constant 0 : index
    %73 = vector.load %arg2[%c2, %c0_45, %c0_46] : memref<4x32x16xf32, #tpu.memory_space<vmem>>, vector<1x32x16xf32>
    %74 = vector.shape_cast %73 : vector<1x32x16xf32> to vector<32x16xf32>
    %cst_47 = arith.constant dense<0.000000e+00> : vector<16x16xf32>
    %75 = tpu.matmul %1, %74, %cst_47 {dimension_numbers = #tpu.dot_dimension_numbers<[1], [0], [0], [1], [0, 0, 1, 1], [], []>} : vector<16x32xf32>, vector<32x16xf32>, vector<16x16xf32> -> vector<16x16xf32>
    %c2_48 = arith.constant 2 : index
    %c0_49 = arith.constant 0 : index
    %c0_50 = arith.constant 0 : index
    %76 = vector.load %arg3[%c2_48, %c0_49, %c0_50] : memref<4x32x16xf32, #tpu.memory_space<vmem>>, vector<1x32x16xf32>
    %77 = vector.shape_cast %76 : vector<1x32x16xf32> to vector<32x16xf32>
    %cst_51 = arith.constant dense<0.000000e+00> : vector<16x16xf32>
    %78 = tpu.matmul %1, %77, %cst_51 {dimension_numbers = #tpu.dot_dimension_numbers<[1], [0], [0], [1], [0, 0, 1, 1], [], []>} : vector<16x32xf32>, vector<32x16xf32>, vector<16x16xf32> -> vector<16x16xf32>
    %c2_52 = arith.constant 2 : index
    %c0_53 = arith.constant 0 : index
    %c0_54 = arith.constant 0 : index
    %79 = vector.load %arg4[%c2_52, %c0_53, %c0_54] : memref<4x32x16xf32, #tpu.memory_space<vmem>>, vector<1x32x16xf32>
    %80 = vector.shape_cast %79 : vector<1x32x16xf32> to vector<32x16xf32>
    %cst_55 = arith.constant dense<0.000000e+00> : vector<16x16xf32>
    %81 = tpu.matmul %1, %80, %cst_55 {dimension_numbers = #tpu.dot_dimension_numbers<[1], [0], [0], [1], [0, 0, 1, 1], [], []>} : vector<16x32xf32>, vector<32x16xf32>, vector<16x16xf32> -> vector<16x16xf32>
    %82 = vector.shape_cast %75 : vector<16x16xf32> to vector<2x8x16xf32>
    %83 = vector.shape_cast %78 : vector<16x16xf32> to vector<2x8x16xf32>
    %84 = vector.shape_cast %81 : vector<16x16xf32> to vector<2x8x16xf32>
    "tpu.trace_start"() <{level = 10 : i32, message = "bik,bjk->bij"}> : () -> ()
    %cst_56 = arith.constant dense<0.000000e+00> : vector<2x8x8xf32>
    %85 = tpu.matmul %82, %83, %cst_56 {dimension_numbers = #tpu.dot_dimension_numbers<[2], [2], [1], [1], [0, 0, 0, 1, 1, 1], [0], [0]>} : vector<2x8x16xf32>, vector<2x8x16xf32>, vector<2x8x8xf32> -> vector<2x8x8xf32>
    "tpu.trace_stop"() : () -> ()
    %cst_57 = arith.constant 2.500000e-01 : f32
    %86 = vector.broadcast %cst_57 : f32 to vector<2x8x8xf32>
    %87 = arith.mulf %85, %86 : vector<2x8x8xf32>
    %cst_58 = arith.constant dense<0xFF800000> : vector<2x8xf32>
    %88 = vector.multi_reduction <maximumf>, %87, %cst_58 [2] : vector<2x8x8xf32> to vector<2x8xf32>
    %89 = vector.shape_cast %88 : vector<2x8xf32> to vector<2x8x1xf32>
    %90 = vector.broadcast %89 : vector<2x8x1xf32> to vector<2x8x8xf32>
    %91 = arith.subf %87, %90 : vector<2x8x8xf32>
    %92 = math.exp %91 : vector<2x8x8xf32>
    %cst_59 = arith.constant dense<0.000000e+00> : vector<2x8xf32>
    %93 = vector.multi_reduction <add>, %92, %cst_59 [2] : vector<2x8x8xf32> to vector<2x8xf32>
    %94 = vector.shape_cast %93 : vector<2x8xf32> to vector<2x8x1xf32>
    "tpu.trace_start"() <{level = 10 : i32, message = "bij,bjk->bik"}> : () -> ()
    %cst_60 = arith.constant dense<0.000000e+00> : vector<2x8x16xf32>
    %95 = tpu.matmul %92, %84, %cst_60 {dimension_numbers = #tpu.dot_dimension_numbers<[2], [1], [1], [2], [0, 0, 0, 1, 1, 2], [0], [0]>} : vector<2x8x8xf32>, vector<2x8x16xf32>, vector<2x8x16xf32> -> vector<2x8x16xf32>
    "tpu.trace_stop"() : () -> ()
    %96 = tpu.reciprocal %94 {approx = true} : vector<2x8x1xf32> -> vector<2x8x1xf32>
    %97 = arith.mulf %94, %96 : vector<2x8x1xf32>
    %cst_61 = arith.constant 2.000000e+00 : f32
    %98 = vector.broadcast %cst_61 : f32 to vector<2x8x1xf32>
    %99 = arith.subf %98, %97 : vector<2x8x1xf32>
    %100 = arith.mulf %96, %99 : vector<2x8x1xf32>
    %101 = vector.broadcast %100 : vector<2x8x1xf32> to vector<2x8x16xf32>
    %102 = arith.mulf %95, %101 : vector<2x8x16xf32>
    %103 = vector.shape_cast %102 : vector<2x8x16xf32> to vector<16x16xf32>
    %c2_62 = arith.constant 2 : index
    %c0_63 = arith.constant 0 : index
    %c0_64 = arith.constant 0 : index
    %104 = vector.load %arg5[%c2_62, %c0_63, %c0_64] : memref<4x16x32xf32, #tpu.memory_space<vmem>>, vector<1x16x32xf32>
    %105 = vector.shape_cast %104 : vector<1x16x32xf32> to vector<16x32xf32>
    %cst_65 = arith.constant dense<0.000000e+00> : vector<16x32xf32>
    %106 = tpu.matmul %103, %105, %cst_65 {dimension_numbers = #tpu.dot_dimension_numbers<[1], [0], [0], [1], [0, 0, 1, 1], [], []>} : vector<16x16xf32>, vector<16x32xf32>, vector<16x32xf32> -> vector<16x32xf32>
    %107 = arith.addf %72, %106 : vector<16x32xf32>
    %c3 = arith.constant 3 : index
    %c0_66 = arith.constant 0 : index
    %c0_67 = arith.constant 0 : index
    %108 = vector.load %arg2[%c3, %c0_66, %c0_67] : memref<4x32x16xf32, #tpu.memory_space<vmem>>, vector<1x32x16xf32>
    %109 = vector.shape_cast %108 : vector<1x32x16xf32> to vector<32x16xf32>
    %cst_68 = arith.constant dense<0.000000e+00> : vector<16x16xf32>
    %110 = tpu.matmul %1, %109, %cst_68 {dimension_numbers = #tpu.dot_dimension_numbers<[1], [0], [0], [1], [0, 0, 1, 1], [], []>} : vector<16x32xf32>, vector<32x16xf32>, vector<16x16xf32> -> vector<16x16xf32>
    %c3_69 = arith.constant 3 : index
    %c0_70 = arith.constant 0 : index
    %c0_71 = arith.constant 0 : index
    %111 = vector.load %arg3[%c3_69, %c0_70, %c0_71] : memref<4x32x16xf32, #tpu.memory_space<vmem>>, vector<1x32x16xf32>
    %112 = vector.shape_cast %111 : vector<1x32x16xf32> to vector<32x16xf32>
    %cst_72 = arith.constant dense<0.000000e+00> : vector<16x16xf32>
    %113 = tpu.matmul %1, %112, %cst_72 {dimension_numbers = #tpu.dot_dimension_numbers<[1], [0], [0], [1], [0, 0, 1, 1], [], []>} : vector<16x32xf32>, vector<32x16xf32>, vector<16x16xf32> -> vector<16x16xf32>
    %c3_73 = arith.constant 3 : index
    %c0_74 = arith.constant 0 : index
    %c0_75 = arith.constant 0 : index
    %114 = vector.load %arg4[%c3_73, %c0_74, %c0_75] : memref<4x32x16xf32, #tpu.memory_space<vmem>>, vector<1x32x16xf32>
    %115 = vector.shape_cast %114 : vector<1x32x16xf32> to vector<32x16xf32>
    %cst_76 = arith.constant dense<0.000000e+00> : vector<16x16xf32>
    %116 = tpu.matmul %1, %115, %cst_76 {dimension_numbers = #tpu.dot_dimension_numbers<[1], [0], [0], [1], [0, 0, 1, 1], [], []>} : vector<16x32xf32>, vector<32x16xf32>, vector<16x16xf32> -> vector<16x16xf32>
    %117 = vector.shape_cast %110 : vector<16x16xf32> to vector<2x8x16xf32>
    %118 = vector.shape_cast %113 : vector<16x16xf32> to vector<2x8x16xf32>
    %119 = vector.shape_cast %116 : vector<16x16xf32> to vector<2x8x16xf32>
    "tpu.trace_start"() <{level = 10 : i32, message = "bik,bjk->bij"}> : () -> ()
    %cst_77 = arith.constant dense<0.000000e+00> : vector<2x8x8xf32>
    %120 = tpu.matmul %117, %118, %cst_77 {dimension_numbers = #tpu.dot_dimension_numbers<[2], [2], [1], [1], [0, 0, 0, 1, 1, 1], [0], [0]>} : vector<2x8x16xf32>, vector<2x8x16xf32>, vector<2x8x8xf32> -> vector<2x8x8xf32>
    "tpu.trace_stop"() : () -> ()
    %cst_78 = arith.constant 2.500000e-01 : f32
    %121 = vector.broadcast %cst_78 : f32 to vector<2x8x8xf32>
    %122 = arith.mulf %120, %121 : vector<2x8x8xf32>
    %cst_79 = arith.constant dense<0xFF800000> : vector<2x8xf32>
    %123 = vector.multi_reduction <maximumf>, %122, %cst_79 [2] : vector<2x8x8xf32> to vector<2x8xf32>
    %124 = vector.shape_cast %123 : vector<2x8xf32> to vector<2x8x1xf32>
    %125 = vector.broadcast %124 : vector<2x8x1xf32> to vector<2x8x8xf32>
    %126 = arith.subf %122, %125 : vector<2x8x8xf32>
    %127 = math.exp %126 : vector<2x8x8xf32>
    %cst_80 = arith.constant dense<0.000000e+00> : vector<2x8xf32>
    %128 = vector.multi_reduction <add>, %127, %cst_80 [2] : vector<2x8x8xf32> to vector<2x8xf32>
    %129 = vector.shape_cast %128 : vector<2x8xf32> to vector<2x8x1xf32>
    "tpu.trace_start"() <{level = 10 : i32, message = "bij,bjk->bik"}> : () -> ()
    %cst_81 = arith.constant dense<0.000000e+00> : vector<2x8x16xf32>
    %130 = tpu.matmul %127, %119, %cst_81 {dimension_numbers = #tpu.dot_dimension_numbers<[2], [1], [1], [2], [0, 0, 0, 1, 1, 2], [0], [0]>} : vector<2x8x8xf32>, vector<2x8x16xf32>, vector<2x8x16xf32> -> vector<2x8x16xf32>
    "tpu.trace_stop"() : () -> ()
    %131 = tpu.reciprocal %129 {approx = true} : vector<2x8x1xf32> -> vector<2x8x1xf32>
    %132 = arith.mulf %129, %131 : vector<2x8x1xf32>
    %cst_82 = arith.constant 2.000000e+00 : f32
    %133 = vector.broadcast %cst_82 : f32 to vector<2x8x1xf32>
    %134 = arith.subf %133, %132 : vector<2x8x1xf32>
    %135 = arith.mulf %131, %134 : vector<2x8x1xf32>
    %136 = vector.broadcast %135 : vector<2x8x1xf32> to vector<2x8x16xf32>
    %137 = arith.mulf %130, %136 : vector<2x8x16xf32>
    %138 = vector.shape_cast %137 : vector<2x8x16xf32> to vector<16x16xf32>
    %c3_83 = arith.constant 3 : index
    %c0_84 = arith.constant 0 : index
    %c0_85 = arith.constant 0 : index
    %139 = vector.load %arg5[%c3_83, %c0_84, %c0_85] : memref<4x16x32xf32, #tpu.memory_space<vmem>>, vector<1x16x32xf32>
    %140 = vector.shape_cast %139 : vector<1x16x32xf32> to vector<16x32xf32>
    %cst_86 = arith.constant dense<0.000000e+00> : vector<16x32xf32>
    %141 = tpu.matmul %138, %140, %cst_86 {dimension_numbers = #tpu.dot_dimension_numbers<[1], [0], [0], [1], [0, 0, 1, 1], [], []>} : vector<16x16xf32>, vector<16x32xf32>, vector<16x32xf32> -> vector<16x32xf32>
    %142 = arith.addf %107, %141 : vector<16x32xf32>
    %c0_87 = arith.constant 0 : index
    %c0_88 = arith.constant 0 : index
    %143 = vector.load %arg6[%c0_87, %c0_88] : memref<1x32xf32, #tpu.memory_space<vmem>>, vector<1x32xf32>
    %144 = vector.broadcast %143 : vector<1x32xf32> to vector<16x32xf32>
    %145 = arith.addf %142, %144 : vector<16x32xf32>
    %146 = vector.shape_cast %145 : vector<16x32xf32> to vector<2x8x32xf32>
    %c0_89 = arith.constant 0 : index
    %c0_90 = arith.constant 0 : index
    %c0_91 = arith.constant 0 : index
    %147 = vector.load %arg7[%c0_89, %c0_90, %c0_91] : memref<2x8x32xf32, #tpu.memory_space<vmem>>, vector<2x8x32xf32>
    tpu.vector_store %arg7[%c0_89, %c0_90, %c0_91], %146 {strides = array<i32>} : memref<2x8x32xf32, #tpu.memory_space<vmem>>, vector<2x8x32xf32>,
    return
  }
  func.func @transform_0(%arg0: i32) -> (i32, i32, i32) {
    %c0_i32 = arith.constant 0 : i32
    %c0_i32_0 = arith.constant 0 : i32
    %c0_i32_1 = arith.constant 0 : i32
    return %arg0, %c0_i32, %c0_i32_0 : i32, i32, i32
  }
  func.func @transform_1(%arg0: i32) -> (i32, i32, i32) {
    %c0_i32 = arith.constant 0 : i32
    %c0_i32_0 = arith.constant 0 : i32
    %c0_i32_1 = arith.constant 0 : i32
    %c0_i32_2 = arith.constant 0 : i32
    return %c0_i32, %c0_i32_0, %c0_i32_1 : i32, i32, i32
  }
  func.func @transform_2(%arg0: i32) -> (i32, i32, i32) {
    %c0_i32 = arith.constant 0 : i32
    %c0_i32_0 = arith.constant 0 : i32
    %c0_i32_1 = arith.constant 0 : i32
    %c0_i32_2 = arith.constant 0 : i32
    return %c0_i32, %c0_i32_0, %c0_i32_1 : i32, i32, i32
  }
  func.func @transform_3(%arg0: i32) -> (i32, i32, i32) {
    %c0_i32 = arith.constant 0 : i32
    %c0_i32_0 = arith.constant 0 : i32
    %c0_i32_1 = arith.constant 0 : i32
    %c0_i32_2 = arith.constant 0 : i32
    return %c0_i32, %c0_i32_0, %c0_i32_1 : i32, i32, i32
  }
  func.func @transform_4(%arg0: i32) -> (i32, i32, i32) {
    %c0_i32 = arith.constant 0 : i32
    %c0_i32_0 = arith.constant 0 : i32
    %c0_i32_1 = arith.constant 0 : i32
    %c0_i32_2 = arith.constant 0 : i32
    return %c0_i32, %c0_i32_0, %c0_i32_1 : i32, i32, i32
  }
  func.func @transform_5(%arg0: i32) -> (i32, i32) {
    %c0_i32 = arith.constant 0 : i32
    %c0_i32_0 = arith.constant 0 : i32
    %c0_i32_1 = arith.constant 0 : i32
    return %c0_i32, %c0_i32_0 : i32, i32
  }
  func.func @transform_6(%arg0: i32) -> (i32, i32, i32) {
    %c0_i32 = arith.constant 0 : i32
    %c0_i32_0 = arith.constant 0 : i32
    %c0_i32_1 = arith.constant 0 : i32
    return %arg0, %c0_i32, %c0_i32_0 : i32, i32, i32
  }
}

</mosaic_0001>

<bundles_post_ra>
// kernel: tpu_custom_call.1
= control target key start
LH: loop header
LB: loop body
LE: loop exit
PB: predicated region body
PF: predicated region fallthrough
CT: control target
= control target key end

     0   :  { %s3583_s0 = inlined_call_operand.vmem [shape: f32[2,8,32], index: 0, kind: input, shape index: {}]   ;;  %s3584_s1 = inlined_call_operand.vmem [shape: f32[4,32,16], index: 1, kind: input, shape index: {}]   ;;  %s3585_s2 = inlined_call_operand.vmem [shape: f32[4,32,16], index: 2, kind: input, shape index: {}]   ;;  %s3586_s3 = inlined_call_operand.vmem [shape: f32[4,32,16], index: 3, kind: input, shape index: {}]   ;;  %s3587_s4 = inlined_call_operand.vmem [shape: f32[4,16,32], index: 4, kind: input, shape index: {}]   ;;  %s3588_s5 = inlined_call_operand.vmem [shape: f32[1,32], index: 5, kind: input, shape index: {}]   ;;  %s3589_s6 = inlined_call_operand.hbm [shape: f32[2,8,32], index: 6, kind: output, shape index: {}]  }
   0x1   :  { %v115_v0 = vld [vmem:[%s3585_s2 + $0x18] sm:$0xff]  ;;  %v114_v2 = vld [vmem:[%s3585_s2 + $0x10] sm:$0xff]  ;;  %v113_v4 = vld [vmem:[%s3585_s2 + $0x8] sm:$0xff] }
   0x2   :  { %v29_v1 = vld [vmem:[%s3584_s1 + $0x18] sm:$0xff]  ;;  %2900 = vmatprep.subr.mxu1 %v115_v0  ;;  %v28_v3 = vld [vmem:[%s3584_s1 + $0x10] sm:$0xff]  ;;  %v27_v5 = vld [vmem:[%s3584_s1 + $0x8] sm:$0xff] }
   0x3   :  { %2889 = vmatprep.subr.mxu0 %v29_v1  ;;  %2901 = vmatpush3.msra.mxu1 %v115_v0 }
   0x4   :  { %2890 = vmatpush3.msra.mxu0 %v29_v1  ;;  %2902 = vmatprep.subr.mxu1 %v114_v2 }
   0x5   :  { %2891 = vmatprep.subr.mxu0 %v28_v3 }
   0x6   :  { %11 = vsyncpa [#allocation3], 0  ;;  %2903 = vmatpush3.msra.mxu1 %v114_v2  ;;  %2892 = vmatpush3.msra.mxu0 %v28_v3  ;;  %v112_v6 = vld [vmem:[%s3585_s2] sm:$0xff]  ;;  %vm30_vm0 = vcmask 261120   ;;  %v3260_v9 = vld [vmem:[%s3583_s0 + $0x8] sm:$0xff]  ;;  %v3188_v10 = vmov 0.0  }
   0x7   :  { %v26_v7 = vld [vmem:[%s3584_s1] sm:$0xff]  ;;  %2904 = vmatprep.subr.mxu1 %v113_v4  ;;  %2893 = vmatprep.subr.mxu0 %v27_v5  ;;  %vm3189_vm1 = vmmov 0   ;;  %v194_v11 = vld [vmem:[%s3586_s3 + $0x18] sm:$0xff]  ;;  %v193_v12 = vld [vmem:[%s3586_s3 + $0x10] sm:$0xff]  ;;  %vm270_vm2 = vcmask 130048   ;;  %vm425_vm3 = vcmask 64512  }
   0x8   :  { %v3255_v8 = vld [vmem:[%s3583_s0] sm:$0xff]  ;;  %2905 = vmatpush3.msra.mxu1 %v113_v4  ;;  %2894 = vmatpush3.msra.mxu0 %v27_v5  ;;  %v192_v13 = vld [vmem:[%s3586_s3 + $0x8] sm:$0xff]  ;;  %v2691_v28 = vld [vmem:[%s3585_s2 + $0x38] sm:$0xff]  ;;  %s3190_s11 = smov [#allocation2]  }
   0x9   :  { %2906 = vmatprep.subr.mxu1 %v112_v6  ;;  %2895 = vmatprep.subr.mxu0 %v26_v7  ;;  %v191_v14 = vld [vmem:[%s3586_s3] sm:$0xff]  ;;  %v2685_v30 = vld [vmem:[%s3584_s1 + $0x38] sm:$0xff]  ;;  %v2690_v38 = vld [vmem:[%s3585_s2 + $0x30] sm:$0xff]  ;;  %s2659_s12 = sshll.u32 %s3190_s11, 4  ;;  %s2660_s12 = int_to_ptr.vmem [resolvable:$true] %s2659_s12 }
   0xa   :  { %2907 = vmatpush3.msra.mxu1 %v112_v6  ;;  %2908 = vmatprep.mubr.msk.f32.mxu1 %vm30_vm0, %v3255_v8  ;;  %v2689_v39 = vld [vmem:[%s3585_s2 + $0x28] sm:$0xff]  ;;  %v2684_v41 = vld [vmem:[%s3584_s1 + $0x30] sm:$0xff]  ;;  %v2688_v43 = vld [vmem:[%s3585_s2 + $0x20] sm:$0xff]  ;;  %s3166_s13 = scalar_lea.vmem %s2660_s12, 256  ;;  %p3171_p1 = scmp.lt.s32.totalorder %s2660_s12, %s2660_s12 }
   0xb   :  { %2896 = vmatpush3.msra.mxu0 %v26_v7  ;;  %2897 = vmatprep.mubr.msk.f32.mxu0 %vm30_vm0, %v3255_v8  ;;  %v2683_v44 = vld [vmem:[%s3584_s1 + $0x28] sm:$0xff]  ;;  %v2682_v45 = vld [vmem:[%s3584_s1 + $0x20] sm:$0xff]  ;;  %v2697_v46 = vld [vmem:[%s3586_s3 + $0x38] sm:$0xff]  ;;  %p3167_p0 = scmp.ne.s32.totalorder %s2660_s12, %s3166_s13  ;;  %p3172_p2 = scmp.lt.s32.totalorder %s3166_s13, %s3166_s13 }
   0xc   :  { %2909 = vmatmul.mubr.msk.f32.vlgmr.msra.gmra.mxu1 %vm30_vm0, %v3260_v9  ;;  %2898 = vmatmul.mubr.msk.f32.vlgmr.msra.gmra.mxu0 %vm30_vm0, %v3260_v9  ;;  %v2696_v47 = vld [vmem:[%s3586_s3 + $0x30] sm:$0xff]  ;;  %v2695_v48 = vld [vmem:[%s3586_s3 + $0x28] sm:$0xff]  ;;  %v2694_v49 = vld [vmem:[%s3586_s3 + $0x20] sm:$0xff] }
   0xd   :  { %2919 = vmatprep.mubr.msk.f32.mxu0 %vm30_vm0, %v3255_v8  ;;  %2922 = vmatprep.subr.mxu1 %v3188_v10  ;;  %v601_v5 = vld [vmem:[%s3587_s4 + $0x8] sm:$0xff]  ;;  %p3173_p3 = por %p3172_p2, %p3171_p1 }
   0xe   :  { %2924 = vmatprep.mubr.msk.f32.mxu1 %vm3189_vm1, %v3188_v10  ;;  %2911 = vmatprep.subr.mxu0 %v194_v11 }
   0xf   :  { %2912 = vmatpush3.msra.mxu0 %v194_v11  ;;  %p3174_p4 = pnand %p3173_p3, %p3167_p0 }
  0x10   :  { %2913 = vmatprep.subr.mxu0 %v193_v12 }
  0x11   :  { %2914 = vmatpush3.msra.mxu0 %v193_v12 }
  0x12   :  { %2915 = vmatprep.subr.mxu0 %v192_v13 }
  0x13   :  { %2916 = vmatpush3.msra.mxu0 %v192_v13 }
  0x14   :  { %2917 = vmatprep.subr.mxu0 %v191_v14 }
  0x15   :  { %2918 = vmatpush3.msra.mxu0 %v191_v14 }
  0x16   :  { %2920 = vmatmul.mubr.msk.f32.vlgmr.msra.gmra.mxu0 %vm30_vm0, %v3260_v9  ;;  %2932 = vmatprep.subr.mxu0 %v3188_v10 }
  0x17   :  { %2934 = vmatprep.mubr.msk.f32.mxu0 %vm3189_vm1, %v3188_v10 }
  0xcc   :  { %v2910_v15 = vpop.f32.mrf.mxu1  ;;  %v2899_v16 = vpop.f32.mrf.mxu0 }
  0xce   :  { %v182_v17 = vpop.f32.mrf.mxu1  ;;  %v103_v18 = vpop.f32.mrf.mxu0 }
  0xcf   :  { %2923 = vmatpush3.xpose.msk.msra.mxu1 %vm270_vm2, %v182_v17 }
  0xd0   :  { %2927 = vmatprep.subr.mxu1 %v3188_v10 }
  0xd2   :  { %2925 = vmatmul.mubr.msk.f32.vlgmr.msra.gmra.mxu1 %vm270_vm2, %v103_v18 }
  0xd3   :  { %2928 = vmatpush3.xpose.msk.msra.mxu1 %vm270_vm2, %v2910_v15  ;;  %2929 = vmatprep.mubr.msk.f32.mxu1 %vm3189_vm1, %v3188_v10 }
  0xd4   :  { %2937 = vmatprep.subr.mxu1 %v3188_v10 }
  0xd6   :  { %2930 = vmatmul.mubr.msk.f32.vlgmr.msra.gmra.mxu1 %vm270_vm2, %v2899_v16  ;;  %v2921_v27 = vpop.f32.mrf.mxu0 }
  0xd7   :  { %2939 = vmatprep.mubr.msk.f32.mxu1 %vm3189_vm1, %v3188_v10  ;;  %2938 = vmatpush3.msra.mxu1 %v2921_v27  ;;  %v600_v27 = vld [vmem:[%s3587_s4] sm:$0xff] }
  0xd8   :  { %v261_v29 = vpop.f32.mrf.mxu0  ;;  %2953 = vmatprep.subr.mxu1 %v2691_v28 }
  0xd9   :  { %2933 = vmatpush3.msra.mxu0 %v261_v29 }
  0xda   :  { %2942 = vmatprep.subr.mxu0 %v2685_v30 }
 0x192   :  { %v343_v19 = vpop.f32.mrf.mxu1 }
 0x193   :  { %v423_v24 = vmul.f32 0.25, %v343_v19 }
 0x194   :  { %v2926_v20 = vpop.f32.mrf.mxu1 }
 0x195   :  { %v426_v26 = vsel %vm425_vm3, %v423_v24, -inf }
 0x196   :  { %v419_v21 = vpop.f32.mrf.mxu1 }
 0x197   :  { %v424_v22 = vmul.f32 0.25, %v419_v21 }
 0x198   :  { %v2931_v23 = vpop.f32.mrf.mxu1 }
 0x199   :  { %v429_v25 = vsel %vm425_vm3, %v424_v22, -inf }
 0x19a   :  { %430 = vmax.xlane.f32.xlu0 %v429_v25 }
 0x19e   :  { %427 = vmax.xlane.f32.xlu0 %v426_v26 }
 0x223   :  { %v431_v31 = vpop.xlane.xlu0 %430 }
 0x224   :  { %v433_v32 = vsub.f32 %v424_v22, %v431_v31 }
 0x226   :  { %v436_v33 = vmul.f32 1.442695, %v433_v32  ;;  %v2721_v32 = vld [vmem:[%s3585_s2 + $0x58] sm:$0xff] }
 0x227   :  { %v428_v34 = vpop.xlane.xlu0 %427 }
 0x228   :  { %3134 = vpow2.f32 %v436_v33  ;;  %v432_v35 = vsub.f32 %v423_v24, %v428_v34  ;;  %v2707_v33 = vld [vmem:[%s3587_s4 + $0x18] sm:$0xff]  ;;  %v2720_v34 = vld [vmem:[%s3585_s2 + $0x50] sm:$0xff] }
 0x22a   :  { %v434_v36 = vmul.f32 1.442695, %v432_v35  ;;  %v2706_v35 = vld [vmem:[%s3587_s4 + $0x10] sm:$0xff] }
 0x22c   :  { %3136 = vpow2.f32 %v434_v36  ;;  %v2719_v36 = vld [vmem:[%s3585_s2 + $0x48] sm:$0xff] }
 0x235   :  { %v3310_v37 = vpop.eup %3134 }
 0x236   :  { %2940 = vmatmul.mubr.msk.f32.vlgmr.msra.gmra.mxu1 %vm425_vm3, %v3310_v37  ;;  %v441_v2 = vsel %vm425_vm3, %v3310_v37, 0.0  ;;  %v2715_v37 = vld [vmem:[%s3584_s1 + $0x58] sm:$0xff] }
 0x237   :  { %2954 = vmatpush3.msra.mxu1 %v2691_v28  ;;  %2961 = vmatprep.mubr.msk.f32.mxu1 %vm30_vm0, %v3255_v8 }
 0x238   :  { %2955 = vmatprep.subr.mxu1 %v2690_v38 }
 0x239   :  { %v3137_v40 = vpop.eup %3136  ;;  %2956 = vmatpush3.msra.mxu1 %v2690_v38  ;;  %v2718_v38 = vld [vmem:[%s3585_s2 + $0x40] sm:$0xff] }
 0x23a   :  { %2957 = vmatprep.subr.mxu1 %v2689_v39  ;;  %2935 = vmatmul.mubr.msk.f32.vlgmr.msra.gmra.mxu0 %vm425_vm3, %v3137_v40  ;;  %v438_v42 = vsel %vm425_vm3, %v3137_v40, 0.0 }
 0x23b   :  { %2943 = vmatpush3.msra.mxu0 %v2685_v30  ;;  %2958 = vmatpush3.msra.mxu1 %v2689_v39 }
 0x23c   :  { %439 = vadd.xlane.f32.xlu0 %v438_v42  ;;  %2944 = vmatprep.subr.mxu0 %v2684_v41 }
 0x23d   :  { %2959 = vmatprep.subr.mxu1 %v2688_v43  ;;  %2945 = vmatpush3.msra.mxu0 %v2684_v41 }
 0x23e   :  { %2960 = vmatpush3.msra.mxu1 %v2688_v43  ;;  %2946 = vmatprep.subr.mxu0 %v2683_v44 }
 0x23f   :  { %2962 = vmatmul.mubr.msk.f32.vlgmr.msra.gmra.mxu1 %vm30_vm0, %v3260_v9  ;;  %2947 = vmatpush3.msra.mxu0 %v2683_v44 }
 0x240   :  { %2948 = vmatprep.subr.mxu0 %v2682_v45  ;;  %2950 = vmatprep.mubr.msk.f32.mxu0 %vm30_vm0, %v3255_v8 }
 0x241   :  { %2949 = vmatpush3.msra.mxu0 %v2682_v45  ;;  %2975 = vmatprep.subr.mxu1 %v3188_v10 }
 0x242   :  { %2951 = vmatmul.mubr.msk.f32.vlgmr.msra.gmra.mxu0 %vm30_vm0, %v3260_v9  ;;  %2977 = vmatprep.mubr.msk.f32.mxu1 %vm3189_vm1, %v3188_v10 }
 0x243   :  { %2972 = vmatprep.mubr.msk.f32.mxu0 %vm30_vm0, %v3255_v8  ;;  %2964 = vmatprep.subr.mxu0 %v2697_v46 }
 0x244   :  { %2965 = vmatpush3.msra.mxu0 %v2697_v46 }
 0x245   :  { %2966 = vmatprep.subr.mxu0 %v2696_v47 }
 0x246   :  { %2967 = vmatpush3.msra.mxu0 %v2696_v47 }
 0x247   :  { %2968 = vmatprep.subr.mxu0 %v2695_v48 }
 0x248   :  { %2969 = vmatpush3.msra.mxu0 %v2695_v48 }
 0x249   :  { %2970 = vmatprep.subr.mxu0 %v2694_v49 }
 0x24a   :  { %2971 = vmatpush3.msra.mxu0 %v2694_v49 }
 0x24b   :  { %2973 = vmatmul.mubr.msk.f32.vlgmr.msra.gmra.mxu0 %vm30_vm0, %v3260_v9  ;;  %2985 = vmatprep.subr.mxu0 %v3188_v10 }
 0x24c   :  { %2987 = vmatprep.mubr.msk.f32.mxu0 %vm3189_vm1, %v3188_v10 }
 0x2c5   :  { %v440_v6 = vpop.xlane.xlu0 %439 }
 0x2c6   :  { %3138 = vrcp.f32 %v440_v6 }
 0x2d3   :  { %v3139_v17 = vpop.eup %3138 }
 0x2d4   :  { %v592_v18 = vmul.f32 %v3139_v17, %v440_v6 }
 0x2d6   :  { %v594_v19 = vsub.f32 2.0, %v592_v18 }
 0x2d8   :  { %v596_v22 = vmul.f32 %v3139_v17, %v594_v19 }
 0x2f6   :  { %v3364_v50 = vpop.f32.mrf.mxu1 }
 0x2f8   :  { %v2941_v51 = vpop.f32.mrf.mxu1 }
 0x2fa   :  { %v513_v52 = vpop.f32.mrf.mxu0 }
 0x2fb   :  { %v598_v24 = vmul.f32 %v596_v22, %v513_v52 }
 0x2fc   :  { %v2936_v53 = vpop.f32.mrf.mxu0 }
 0x2ff   :  { %v2963_v54 = vpop.f32.mrf.mxu1 }
 0x301   :  { %v753_v55 = vpop.f32.mrf.mxu1 }
 0x302   :  { %2976 = vmatpush3.xpose.msk.msra.mxu1 %vm270_vm2, %v753_v55  ;;  %v2952_v56 = vpop.f32.mrf.mxu0  ;;  %v2714_v55 = vld [vmem:[%s3584_s1 + $0x50] sm:$0xff] }
 0x303   :  { %2980 = vmatprep.subr.mxu1 %v3188_v10 }
 0x304   :  { %v673_v57 = vpop.f32.mrf.mxu0 }
 0x305   :  { %2978 = vmatmul.mubr.msk.f32.vlgmr.msra.gmra.mxu1 %vm270_vm2, %v673_v57  ;;  %v2712_v57 = vld [vmem:[%s3584_s1 + $0x40] sm:$0xff] }
 0x306   :  { %2981 = vmatpush3.xpose.msk.msra.mxu1 %vm270_vm2, %v2963_v54  ;;  %2982 = vmatprep.mubr.msk.f32.mxu1 %vm3189_vm1, %v3188_v10 }
 0x307   :  { %2990 = vmatprep.subr.mxu1 %v3188_v10 }
 0x309   :  { %2983 = vmatmul.mubr.msk.f32.vlgmr.msra.gmra.mxu1 %vm270_vm2, %v2952_v56  ;;  %v2713_v56 = vld [vmem:[%s3584_s1 + $0x48] sm:$0xff] }
 0x30a   :  { %2992 = vmatprep.mubr.msk.f32.mxu1 %vm3189_vm1, %v3188_v10 }
 0x30b   :  { %v2974_v3 = vpop.f32.mrf.mxu0 }
 0x30c   :  { %2991 = vmatpush3.msra.mxu1 %v2974_v3 }
 0x30d   :  { %v833_v4 = vpop.f32.mrf.mxu0  ;;  %3002 = vmatprep.subr.mxu1 %v601_v5 }
 0x30e   :  { %2986 = vmatpush3.msra.mxu0 %v833_v4 }
 0x30f   :  { %2995 = vmatprep.subr.mxu0 %v2707_v33 }
 0x3c5   :  { %v914_v58 = vpop.f32.mrf.mxu1 }
 0x3c6   :  { %v994_v59 = vmul.f32 0.25, %v914_v58 }
 0x3c7   :  { %v2979_v60 = vpop.f32.mrf.mxu1 }
 0x3c8   :  { %v996_v61 = vsel %vm425_vm3, %v994_v59, -inf }
 0x3c9   :  { %997 = vmax.xlane.f32.xlu1 %v996_v61  ;;  %v990_v62 = vpop.f32.mrf.mxu1 }
 0x3ca   :  { %v995_v63 = vmul.f32 0.25, %v990_v62  ;;  %v2727_v62 = vld [vmem:[%s3586_s3 + $0x58] sm:$0xff] }
 0x3cb   :  { %v2984_v0 = vpop.f32.mrf.mxu1 }
 0x3cc   :  { %v999_v1 = vsel %vm425_vm3, %v995_v63, -inf  ;;  %v2725_v0 = vld [vmem:[%s3586_s3 + $0x48] sm:$0xff] }
 0x3cd   :  { %1000 = vmax.xlane.f32.xlu1 %v999_v1  ;;  %v2724_v1 = vld [vmem:[%s3586_s3 + $0x40] sm:$0xff] }
 0x3d1   :  { %442 = vadd.xlane.f32.xlu1 %v441_v2 }
 0x452   :  { %v998_v7 = vpop.xlane.xlu1 %997 }
 0x453   :  { %v1002_v11 = vsub.f32 %v994_v59, %v998_v7 }
 0x455   :  { %v1004_v12 = vmul.f32 1.442695, %v1002_v11 }
 0x456   :  { %v1001_v13 = vpop.xlane.xlu1 %1000 }
 0x457   :  { %3140 = vpow2.f32 %v1004_v12  ;;  %v1003_v14 = vsub.f32 %v995_v63, %v1001_v13  ;;  %v2726_v63 = vld [vmem:[%s3586_s3 + $0x50] sm:$0xff] }
 0x459   :  { %v1006_v15 = vmul.f32 1.442695, %v1003_v14 }
 0x45a   :  { %v443_v16 = vpop.xlane.xlu1 %442 }
 0x45b   :  { %3142 = vpow2.f32 %v1006_v15 }
 0x45c   :  { %3144 = vrcp.f32 %v443_v16 }
 0x464   :  { %v3141_v20 = vpop.eup %3140 }
 0x465   :  { %2988 = vmatmul.mubr.msk.f32.vlgmr.msra.gmra.mxu0 %vm425_vm3, %v3141_v20  ;;  %v1008_v21 = vsel %vm425_vm3, %v3141_v20, 0.0 }
 0x466   :  { %1009 = vadd.xlane.f32.xlu0 %v1008_v21  ;;  %2996 = vmatpush3.msra.mxu0 %v2707_v33  ;;  %v2742_v33 = vld [vmem:[%s3584_s1 + $0x70] sm:$0xff] }
 0x467   :  { %2997 = vmatprep.subr.mxu0 %v2706_v35 }
 0x468   :  { %v3143_v23 = vpop.eup %3142  ;;  %2998 = vmatpush3.msra.mxu0 %v2706_v35  ;;  %v2740_v35 = vld [vmem:[%s3584_s1 + $0x60] sm:$0xff] }
 0x469   :  { %v3145_v25 = vpop.eup %3144  ;;  %2993 = vmatmul.mubr.msk.f32.vlgmr.msra.gmra.mxu1 %vm425_vm3, %v3143_v23  ;;  %v1011_v26 = vsel %vm425_vm3, %v3143_v23, 0.0  ;;  %3009 = vmatprep.subr.mxu0 %v2715_v37 }
 0x46a   :  { %v593_v28 = vmul.f32 %v3145_v25, %v443_v16  ;;  %1012 = vadd.xlane.f32.xlu1 %v1011_v26  ;;  %3006 = vmatprep.mubr.msk.f32.mxu1 %vm270_vm2, %v598_v24 }
 0x46b   :  { %3003 = vmatpush3.msra.mxu1 %v601_v5 }
 0x46c   :  { %v595_v29 = vsub.f32 2.0, %v593_v28  ;;  %3004 = vmatprep.subr.mxu1 %v600_v27 }
 0x46d   :  { %3005 = vmatpush3.msra.mxu1 %v600_v27 }
 0x46e   :  { %v597_v30 = vmul.f32 %v3145_v25, %v595_v29  ;;  %3020 = vmatprep.subr.mxu1 %v2721_v32  ;;  %v2737_v29 = vld [vmem:[%s3587_s4 + $0x28] sm:$0xff] }
 0x470   :  { %v599_v31 = vmul.f32 %v597_v30, %v3364_v50  ;;  %v2736_v30 = vld [vmem:[%s3587_s4 + $0x20] sm:$0xff] }
 0x472   :  { %3007 = vmatmul.mubr.msk.f32.vlgmr.msra.gmra.mxu1 %vm270_vm2, %v599_v31  ;;  %v2749_v31 = vld [vmem:[%s3585_s2 + $0x78] sm:$0xff] }
 0x473   :  { %3028 = vmatprep.mubr.msk.f32.mxu1 %vm30_vm0, %v3255_v8  ;;  %3021 = vmatpush3.msra.mxu1 %v2721_v32  ;;  %v2743_v32 = vld [vmem:[%s3584_s1 + $0x78] sm:$0xff] }
 0x474   :  { %3022 = vmatprep.subr.mxu1 %v2720_v34 }
 0x475   :  { %3023 = vmatpush3.msra.mxu1 %v2720_v34  ;;  %v2741_v34 = vld [vmem:[%s3584_s1 + $0x68] sm:$0xff] }
 0x476   :  { %3024 = vmatprep.subr.mxu1 %v2719_v36 }
 0x477   :  { %3025 = vmatpush3.msra.mxu1 %v2719_v36 }
 0x478   :  { %3026 = vmatprep.subr.mxu1 %v2718_v38 }
 0x479   :  { %3027 = vmatpush3.msra.mxu1 %v2718_v38 }
 0x47a   :  { %3029 = vmatmul.mubr.msk.f32.vlgmr.msra.gmra.mxu1 %vm30_vm0, %v3260_v9  ;;  %3042 = vmatprep.subr.mxu1 %v3188_v10 }
 0x47b   :  { %3044 = vmatprep.mubr.msk.f32.mxu1 %vm3189_vm1, %v3188_v10 }
 0x4ef   :  { %v1010_v39 = vpop.xlane.xlu0 %1009 }
 0x4f0   :  { %3146 = vrcp.f32 %v1010_v39 }
 0x4f3   :  { %v1013_v40 = vpop.xlane.xlu1 %1012 }
 0x4f4   :  { %3148 = vrcp.f32 %v1013_v40 }
 0x4fd   :  { %v3147_v41 = vpop.eup %3146 }
 0x4fe   :  { %v1162_v42 = vmul.f32 %v3147_v41, %v1010_v39 }
 0x500   :  { %v1164_v44 = vsub.f32 2.0, %v1162_v42 }
 0x501   :  { %v3149_v43 = vpop.eup %3148 }
 0x502   :  { %v1163_v45 = vmul.f32 %v3149_v43, %v1013_v40  ;;  %v1166_v47 = vmul.f32 %v3147_v41, %v1164_v44 }
 0x504   :  { %v1165_v46 = vsub.f32 2.0, %v1163_v45 }
 0x506   :  { %v1167_v51 = vmul.f32 %v3149_v43, %v1165_v46 }
 0x525   :  { %v1083_v48 = vpop.f32.mrf.mxu0 }
 0x526   :  { %v1168_v49 = vmul.f32 %v1166_v47, %v1083_v48 }
 0x527   :  { %v2989_v50 = vpop.f32.mrf.mxu0 }
 0x528   :  { %2999 = vmatprep.mubr.msk.f32.mxu0 %vm270_vm2, %v1168_v49 }
 0x529   :  { %v1156_v52 = vpop.f32.mrf.mxu1 }
 0x52a   :  { %v1169_v53 = vmul.f32 %v1167_v51, %v1156_v52  ;;  %v2748_v52 = vld [vmem:[%s3585_s2 + $0x70] sm:$0xff] }
 0x52b   :  { %v2994_v54 = vpop.f32.mrf.mxu1 }
 0x52c   :  { %3000 = vmatmul.mubr.msk.f32.vlgmr.msra.gmra.mxu0 %vm270_vm2, %v1169_v53  ;;  %v2747_v53 = vld [vmem:[%s3585_s2 + $0x68] sm:$0xff]  ;;  %v2746_v54 = vld [vmem:[%s3585_s2 + $0x60] sm:$0xff] }
 0x52d   :  { %3010 = vmatpush3.msra.mxu0 %v2715_v37  ;;  %3017 = vmatprep.mubr.msk.f32.mxu0 %vm30_vm0, %v3255_v8 }
 0x52e   :  { %3011 = vmatprep.subr.mxu0 %v2714_v55 }
 0x52f   :  { %3012 = vmatpush3.msra.mxu0 %v2714_v55  ;;  %v2754_v55 = vld [vmem:[%s3586_s3 + $0x70] sm:$0xff] }
 0x530   :  { %3013 = vmatprep.subr.mxu0 %v2713_v56 }
 0x531   :  { %3014 = vmatpush3.msra.mxu0 %v2713_v56  ;;  %v2753_v56 = vld [vmem:[%s3586_s3 + $0x68] sm:$0xff] }
 0x532   :  { %3015 = vmatprep.subr.mxu0 %v2712_v57  ;;  %v3438_v58 = vpop.f32.mrf.mxu1 }
 0x533   :  { %3016 = vmatpush3.msra.mxu0 %v2712_v57  ;;  %v2752_v57 = vld [vmem:[%s3586_s3 + $0x60] sm:$0xff] }
 0x534   :  { %3018 = vmatmul.mubr.msk.f32.vlgmr.msra.gmra.mxu0 %vm30_vm0, %v3260_v9  ;;  %v3440_v59 = vpop.f32.mrf.mxu1  ;;  %3031 = vmatprep.subr.mxu0 %v2727_v62 }
 0x535   :  { %3039 = vmatprep.mubr.msk.f32.mxu0 %vm30_vm0, %v3255_v8  ;;  %3032 = vmatpush3.msra.mxu0 %v2727_v62 }
 0x536   :  { %3033 = vmatprep.subr.mxu0 %v2726_v63 }
 0x537   :  { %3034 = vmatpush3.msra.mxu0 %v2726_v63 }
 0x538   :  { %3035 = vmatprep.subr.mxu0 %v2725_v0 }
 0x539   :  { %3036 = vmatpush3.msra.mxu0 %v2725_v0 }
 0x53a   :  { %v3030_v60 = vpop.f32.mrf.mxu1  ;;  %3037 = vmatprep.subr.mxu0 %v2724_v1 }
 0x53b   :  { %3038 = vmatpush3.msra.mxu0 %v2724_v1 }
 0x53c   :  { %v1486_v61 = vpop.f32.mrf.mxu1  ;;  %3040 = vmatmul.mubr.msk.f32.vlgmr.msra.gmra.mxu0 %vm30_vm0, %v3260_v9  ;;  %3052 = vmatprep.subr.mxu0 %v3188_v10 }
 0x53d   :  { %3043 = vmatpush3.xpose.msk.msra.mxu1 %vm270_vm2, %v1486_v61  ;;  %3054 = vmatprep.mubr.msk.f32.mxu0 %vm3189_vm1, %v3188_v10 }
 0x53e   :  { %3047 = vmatprep.subr.mxu1 %v3188_v10 }
 0x5ec   :  { %v3461_v2 = vpop.f32.mrf.mxu0 }
 0x5ee   :  { %v3463_v3 = vpop.f32.mrf.mxu0 }
 0x5ef   :  { %v1327_v62 = vadd.f32 %v3440_v59, %v3463_v3 }
 0x5f4   :  { %v3019_v4 = vpop.f32.mrf.mxu0 }
 0x5f6   :  { %v1406_v5 = vpop.f32.mrf.mxu0 }
 0x5f7   :  { %3045 = vmatmul.mubr.msk.f32.vlgmr.msra.gmra.mxu1 %vm270_vm2, %v1406_v5 }
 0x5f8   :  { %3048 = vmatpush3.xpose.msk.msra.mxu1 %vm270_vm2, %v3030_v60  ;;  %3049 = vmatprep.mubr.msk.f32.mxu1 %vm3189_vm1, %v3188_v10  ;;  %v1332_v60 = vadd.f32 %v3438_v58, %v3461_v2 }
 0x5f9   :  { %3057 = vmatprep.subr.mxu1 %v3188_v10 }
 0x5fb   :  { %3050 = vmatmul.mubr.msk.f32.vlgmr.msra.gmra.mxu1 %vm270_vm2, %v3019_v4 }
 0x5fc   :  { %3059 = vmatprep.mubr.msk.f32.mxu1 %vm3189_vm1, %v3188_v10  ;;  %v3041_v17 = vpop.f32.mrf.mxu0 }
 0x5fd   :  { %3058 = vmatpush3.msra.mxu1 %v3041_v17 }
 0x5fe   :  { %v1566_v18 = vpop.f32.mrf.mxu0  ;;  %3069 = vmatprep.subr.mxu1 %v2743_v32 }
 0x5ff   :  { %3053 = vmatpush3.msra.mxu0 %v1566_v18 }
 0x600   :  { %3062 = vmatprep.subr.mxu0 %v2737_v29 }
 0x6b7   :  { %v1647_v6 = vpop.f32.mrf.mxu1 }
 0x6b8   :  { %v1727_v7 = vmul.f32 0.25, %v1647_v6 }
 0x6b9   :  { %v3046_v11 = vpop.f32.mrf.mxu1 }
 0x6ba   :  { %v1729_v12 = vsel %vm425_vm3, %v1727_v7, -inf }
 0x6bb   :  { %1730 = vmax.xlane.f32.xlu0 %v1729_v12  ;;  %v1723_v13 = vpop.f32.mrf.mxu1 }
 0x6bc   :  { %v1728_v14 = vmul.f32 0.25, %v1723_v13 }
 0x6bd   :  { %v3051_v15 = vpop.f32.mrf.mxu1 }
 0x6be   :  { %v1732_v16 = vsel %vm425_vm3, %v1728_v14, -inf }
 0x6bf   :  { %1733 = vmax.xlane.f32.xlu1 %v1732_v16 }
 0x744   :  { %v1731_v19 = vpop.xlane.xlu0 %1730 }
 0x745   :  { %v1735_v20 = vsub.f32 %v1727_v7, %v1731_v19 }
 0x747   :  { %v1737_v21 = vmul.f32 1.442695, %v1735_v20 }
 0x748   :  { %v1734_v22 = vpop.xlane.xlu1 %1733 }
 0x749   :  { %3150 = vpow2.f32 %v1737_v21  ;;  %v1736_v23 = vsub.f32 %v1728_v14, %v1734_v22 }
 0x74b   :  { %v1739_v24 = vmul.f32 1.442695, %v1736_v23 }
 0x74d   :  { %3152 = vpow2.f32 %v1739_v24 }
 0x756   :  { %v3151_v25 = vpop.eup %3150 }
 0x757   :  { %3055 = vmatmul.mubr.msk.f32.vlgmr.msra.gmra.mxu0 %vm425_vm3, %v3151_v25  ;;  %v1741_v26 = vsel %vm425_vm3, %v3151_v25, 0.0  ;;  %v2765_v25 = vld [vmem:[%s3587_s4 + $0x38] sm:$0xff] }
 0x758   :  { %1742 = vadd.xlane.f32.xlu0 %v1741_v26  ;;  %3063 = vmatpush3.msra.mxu0 %v2737_v29  ;;  %v2764_v26 = vld [vmem:[%s3587_s4 + $0x30] sm:$0xff] }
 0x759   :  { %3064 = vmatprep.subr.mxu0 %v2736_v30 }
 0x75a   :  { %v3153_v27 = vpop.eup %3152  ;;  %3065 = vmatpush3.msra.mxu0 %v2736_v30 }
 0x75b   :  { %3060 = vmatmul.mubr.msk.f32.vlgmr.msra.gmra.mxu1 %vm425_vm3, %v3153_v27  ;;  %v1744_v28 = vsel %vm425_vm3, %v3153_v27, 0.0  ;;  %3080 = vmatprep.subr.mxu0 %v2749_v31 }
 0x75c   :  { %1745 = vadd.xlane.f32.xlu1 %v1744_v28  ;;  %3077 = vmatprep.mubr.msk.f32.mxu1 %vm30_vm0, %v3255_v8 }
 0x75d   :  { %3070 = vmatpush3.msra.mxu1 %v2743_v32 }
 0x75e   :  { %3071 = vmatprep.subr.mxu1 %v2742_v33 }
 0x75f   :  { %3072 = vmatpush3.msra.mxu1 %v2742_v33 }
 0x760   :  { %3073 = vmatprep.subr.mxu1 %v2741_v34 }
 0x761   :  { %3074 = vmatpush3.msra.mxu1 %v2741_v34 }
 0x762   :  { %3075 = vmatprep.subr.mxu1 %v2740_v35 }
 0x763   :  { %3076 = vmatpush3.msra.mxu1 %v2740_v35 }
 0x764   :  { %3078 = vmatmul.mubr.msk.f32.vlgmr.msra.gmra.mxu1 %vm30_vm0, %v3260_v9 }
 0x765   :  { %3099 = vmatprep.mubr.msk.f32.mxu1 %vm30_vm0, %v3255_v8 }
 0x7e1   :  { %v1743_v36 = vpop.xlane.xlu0 %1742 }
 0x7e2   :  { %3154 = vrcp.f32 %v1743_v36 }
 0x7e5   :  { %v1746_v37 = vpop.xlane.xlu1 %1745 }
 0x7e6   :  { %3156 = vrcp.f32 %v1746_v37 }
 0x7ef   :  { %v3155_v38 = vpop.eup %3154 }
 0x7f0   :  { %v1895_v39 = vmul.f32 %v3155_v38, %v1743_v36 }
 0x7f2   :  { %v1897_v41 = vsub.f32 2.0, %v1895_v39 }
 0x7f3   :  { %v3157_v40 = vpop.eup %3156 }
 0x7f4   :  { %v1896_v42 = vmul.f32 %v3157_v40, %v1746_v37  ;;  %v1899_v44 = vmul.f32 %v3155_v38, %v1897_v41 }
 0x7f6   :  { %v1898_v43 = vsub.f32 2.0, %v1896_v42 }
 0x7f8   :  { %v1900_v48 = vmul.f32 %v3157_v40, %v1898_v43 }
 0x817   :  { %v1816_v45 = vpop.f32.mrf.mxu0 }
 0x818   :  { %v1901_v46 = vmul.f32 %v1899_v44, %v1816_v45  ;;  %v2768_v44 = vld [vmem:[%s3588_s5] ss:$0 sm:$0xff] }
 0x819   :  { %v3056_v47 = vpop.f32.mrf.mxu0 }
 0x81a   :  { %3066 = vmatprep.mubr.msk.f32.mxu0 %vm270_vm2, %v1901_v46 }
 0x81b   :  { %v1889_v49 = vpop.f32.mrf.mxu1 }
 0x81c   :  { %v1902_v50 = vmul.f32 %v1900_v48, %v1889_v49 }
 0x81d   :  { %v3061_v51 = vpop.f32.mrf.mxu1 }
 0x81e   :  { %3067 = vmatmul.mubr.msk.f32.vlgmr.msra.gmra.mxu0 %vm270_vm2, %v1902_v50 }
 0x81f   :  { %3081 = vmatpush3.msra.mxu0 %v2749_v31  ;;  %3088 = vmatprep.mubr.msk.f32.mxu0 %vm30_vm0, %v3255_v8  ;;  %v2755_v8 = vld [vmem:[%s3586_s3 + $0x78] sm:$0xff] }
 0x820   :  { %3082 = vmatprep.subr.mxu0 %v2748_v52  ;;  %3091 = vmatprep.subr.mxu1 %v2755_v8 }
 0x821   :  { %3083 = vmatpush3.msra.mxu0 %v2748_v52  ;;  %3092 = vmatpush3.msra.mxu1 %v2755_v8 }
 0x822   :  { %3084 = vmatprep.subr.mxu0 %v2747_v53  ;;  %3093 = vmatprep.subr.mxu1 %v2754_v55 }
 0x823   :  { %3085 = vmatpush3.msra.mxu0 %v2747_v53  ;;  %3094 = vmatpush3.msra.mxu1 %v2754_v55 }
 0x824   :  { %3086 = vmatprep.subr.mxu0 %v2746_v54  ;;  %3095 = vmatprep.subr.mxu1 %v2753_v56  ;;  %v3079_v5 = vpop.f32.mrf.mxu1 }
 0x825   :  { %3087 = vmatpush3.msra.mxu0 %v2746_v54  ;;  %3096 = vmatpush3.msra.mxu1 %v2753_v56 }
 0x826   :  { %3089 = vmatmul.mubr.msk.f32.vlgmr.msra.gmra.mxu0 %vm30_vm0, %v3260_v9  ;;  %3102 = vmatprep.subr.mxu0 %v3188_v10  ;;  %v2060_v6 = vpop.f32.mrf.mxu1 }
 0x827   :  { %3104 = vmatprep.mubr.msk.f32.mxu0 %vm3189_vm1, %v3188_v10  ;;  %3097 = vmatprep.subr.mxu1 %v2752_v57 }
 0x828   :  { %3098 = vmatpush3.msra.mxu1 %v2752_v57 }
 0x829   :  { %3100 = vmatmul.mubr.msk.f32.vlgmr.msra.gmra.mxu1 %vm30_vm0, %v3260_v9  ;;  %3112 = vmatprep.subr.mxu1 %v3188_v10 }
 0x82a   :  { %3114 = vmatprep.mubr.msk.f32.mxu1 %vm3189_vm1, %v3188_v10 }
 0x8de   :  { %v3068_v61 = vpop.f32.mrf.mxu0 }
 0x8df   :  { %v3545_v63 = vadd.f32 %v3068_v61, %v1332_v60 }
 0x8e0   :  { %v1978_v0 = vpop.f32.mrf.mxu0 }
 0x8e1   :  { %v3547_v1 = vadd.f32 %v1978_v0, %v1327_v62 }
 0x8e6   :  { %v3090_v4 = vpop.f32.mrf.mxu0 }
 0x8e8   :  { %v2140_v9 = vpop.f32.mrf.mxu0 }
 0x8e9   :  { %3103 = vmatpush3.xpose.msk.msra.mxu0 %vm270_vm2, %v2140_v9  ;;  %v3101_v14 = vpop.f32.mrf.mxu1 }
 0x8ea   :  { %3107 = vmatprep.subr.mxu0 %v3188_v10 }
 0x8eb   :  { %v2220_v15 = vpop.f32.mrf.mxu1 }
 0x8ec   :  { %3105 = vmatmul.mubr.msk.f32.vlgmr.msra.gmra.mxu0 %vm270_vm2, %v2060_v6  ;;  %3113 = vmatpush3.msra.mxu1 %v2220_v15 }
 0x8ed   :  { %3108 = vmatpush3.xpose.msk.msra.mxu0 %vm270_vm2, %v3090_v4  ;;  %3109 = vmatprep.mubr.msk.f32.mxu0 %vm3189_vm1, %v3188_v10 }
 0x8ee   :  { %3117 = vmatprep.subr.mxu0 %v3188_v10  ;;  %3122 = vmatprep.subr.mxu1 %v2765_v25 }
 0x8f0   :  { %3110 = vmatmul.mubr.msk.f32.vlgmr.msra.gmra.mxu0 %vm270_vm2, %v3079_v5 }
 0x8f1   :  { %3119 = vmatprep.mubr.msk.f32.mxu0 %vm3189_vm1, %v3188_v10  ;;  %3118 = vmatpush3.msra.mxu0 %v3101_v14 }
 0x9ac   :  { %v2301_v58 = vpop.f32.mrf.mxu0 }
 0x9ad   :  { %v2381_v59 = vmul.f32 0.25, %v2301_v58 }
 0x9ae   :  { %v3106_v2 = vpop.f32.mrf.mxu0 }
 0x9af   :  { %v2383_v3 = vsel %vm425_vm3, %v2381_v59, -inf }
 0x9b0   :  { %2384 = vmax.xlane.f32.xlu0 %v2383_v3  ;;  %v2377_v7 = vpop.f32.mrf.mxu0 }
 0x9b1   :  { %v2382_v11 = vmul.f32 0.25, %v2377_v7 }
 0x9b2   :  { %v3111_v12 = vpop.f32.mrf.mxu0 }
 0x9b3   :  { %v2386_v13 = vsel %vm425_vm3, %v2382_v11, -inf }
 0x9b4   :  { %2387 = vmax.xlane.f32.xlu1 %v2386_v13 }
 0xa39   :  { %v2385_v16 = vpop.xlane.xlu0 %2384 }
 0xa3a   :  { %v2389_v17 = vsub.f32 %v2381_v59, %v2385_v16 }
 0xa3c   :  { %v2391_v18 = vmul.f32 1.442695, %v2389_v17 }
 0xa3d   :  { %v2388_v10 = vpop.xlane.xlu1 %2387 }
 0xa3e   :  { %3158 = vpow2.f32 %v2391_v18  ;;  %v2390_v19 = vsub.f32 %v2382_v11, %v2388_v10 }
 0xa40   :  { %v2393_v20 = vmul.f32 1.442695, %v2390_v19 }
 0xa42   :  { %3160 = vpow2.f32 %v2393_v20 }
 0xa4b   :  { %v3159_v21 = vpop.eup %3158 }
 0xa4c   :  { %3115 = vmatmul.mubr.msk.f32.vlgmr.msra.gmra.mxu1 %vm425_vm3, %v3159_v21  ;;  %v2395_v22 = vsel %vm425_vm3, %v3159_v21, 0.0 }
 0xa4d   :  { %2396 = vadd.xlane.f32.xlu0 %v2395_v22  ;;  %3123 = vmatpush3.msra.mxu1 %v2765_v25 }
 0xa4e   :  { %3124 = vmatprep.subr.mxu1 %v2764_v26 }
 0xa4f   :  { %v3161_v23 = vpop.eup %3160  ;;  %3125 = vmatpush3.msra.mxu1 %v2764_v26 }
 0xa50   :  { %3120 = vmatmul.mubr.msk.f32.vlgmr.msra.gmra.mxu0 %vm425_vm3, %v3161_v23  ;;  %v2398_v24 = vsel %vm425_vm3, %v3161_v23, 0.0 }
 0xa51   :  { %2399 = vadd.xlane.f32.xlu1 %v2398_v24 }
 0xad6   :  { %v2397_v27 = vpop.xlane.xlu0 %2396 }
 0xad7   :  { %3162 = vrcp.f32 %v2397_v27 }
 0xada   :  { %v2400_v28 = vpop.xlane.xlu1 %2399 }
 0xadb   :  { %3164 = vrcp.f32 %v2400_v28 }
 0xae4   :  { %v3163_v29 = vpop.eup %3162 }
 0xae5   :  { %v2549_v30 = vmul.f32 %v3163_v29, %v2397_v27 }
 0xae7   :  { %v2551_v32 = vsub.f32 2.0, %v2549_v30 }
 0xae8   :  { %v3165_v31 = vpop.eup %3164 }
 0xae9   :  { %v2550_v33 = vmul.f32 %v3165_v31, %v2400_v28  ;;  %v2553_v35 = vmul.f32 %v3163_v29, %v2551_v32 }
 0xaeb   :  { %v2552_v34 = vsub.f32 2.0, %v2550_v33 }
 0xaed   :  { %v2554_v39 = vmul.f32 %v3165_v31, %v2552_v34 }
 0xb0c   :  { %v2470_v36 = vpop.f32.mrf.mxu1 }
 0xb0d   :  { %v2555_v37 = vmul.f32 %v2553_v35, %v2470_v36 }
 0xb0e   :  { %v3116_v38 = vpop.f32.mrf.mxu1 }
 0xb0f   :  { %3126 = vmatprep.mubr.msk.f32.mxu1 %vm270_vm2, %v2555_v37 }
 0xb10   :  { %v2543_v40 = vpop.f32.mrf.mxu0 }
 0xb11   :  { %v2556_v41 = vmul.f32 %v2554_v39, %v2543_v40 }
 0xb12   :  { %v3121_v42 = vpop.f32.mrf.mxu0 }
 0xb13   :  { %3127 = vmatmul.mubr.msk.f32.vlgmr.msra.gmra.mxu1 %vm270_vm2, %v2556_v41 }
 0xbd3   :  { %v3128_v43 = vpop.f32.mrf.mxu1 }
 0xbd4   :  { %v2642_v45 = vadd.f32 %v3128_v43, %v3545_v63 }
 0xbd5   :  { %v2632_v46 = vpop.f32.mrf.mxu1 }
 0xbd6   :  { %v2651_v47 = vadd.f32 %v2768_v44, %v2642_v45  ;;  %v2641_v48 = vadd.f32 %v2632_v46, %v3547_v1 }
 0xbd8   :  { %2653 = vst.msk [vmem:[#allocation2 + $0x8] sm:$0xff] %vm30_vm0, %v2651_v47  ;;  %v2650_v49 = vadd.f32 %v2768_v44, %v2641_v48 }
 0xbda   :  { %2652 = vst.msk [vmem:[#allocation2] sm:$0xff] %vm30_vm0, %v2650_v49 }
 0xbdb   :  { %3177 = shalt.err (!%p3174_p4)
}
 0xbdc   :  { %s3191_s5 = smov 128   ;;  %s3192_s14 = smov 8  }
 0xbdd   :  { %2665 = dma.vmem_to_hbm [thread:$0]  %s2660_s12, 256, %s3589_s6, [#allocation3], %s3191_s5, %s3191_s5, %s3192_s14  }
 0xbde   :  { %3186 = dma.done.wait [#allocation3], 256  }
 0xbdf   :  { %3187 = vsyncadd [#allocation3], 4294967040 }
 0xbe0   :  { %2669 = vsyncpa [#allocation3], 1 }

</bundles_post_ra>
